<compile_context>
chip_gen: v6e
topology: v6e:2x2x1
jax: 0.10.0
libtpu: 0.0.40
codegen_flags: <defaults>
</compile_context>

<pallas_src>
import functools

import jax
import jax.numpy as jnp
from jax.experimental import pallas as pl
from jax.experimental.pallas import tpu as pltpu


def _round_up(x, m):
    return ((x + m - 1) // m) * m


# ----------------------------------------------------------------------------
# Kernels
# ----------------------------------------------------------------------------
def _critic_rnn_kernel(x_ref, h0_ref, c0_ref, w_x_ref, w_h_ref, consts_ref,
                       out_ref, *, H, matmul_dtype):
    """Fused step with explicit (h0, c0).

    x_ref:      (TB, n_in)        native dtype, cast to matmul_dtype in-kernel
    h0_ref:     (TB, H)           native dtype
    c0_ref:     (TB, H)           native dtype
    w_x_ref:    (n_in, 4H)        W_emb @ W_ih, gate cols permuted [i,f,o,g]
    w_h_ref:    (H, 4H)           W_hh, gate cols permuted [i,f,o,g]
    consts_ref: (2, 4H) f32       row0 = fused gate bias (permuted),
                                  row1 = [w_out row | b_out | zeros]
    out_ref:    (TB, PACK)        lane slices [h | c | out | (unwritten pad)]
    """
    # Two accumulating MXU dots (f32 accumulation).
    gates = jnp.dot(x_ref[...].astype(matmul_dtype), w_x_ref[...],
                    preferred_element_type=jnp.float32)
    gates = gates + jnp.dot(h0_ref[...].astype(matmul_dtype), w_h_ref[...],
                            preferred_element_type=jnp.float32)
    gates = gates + consts_ref[0:1, :]

    # Permuted gate order [i, f, o, g]: sigmoid on 3H cols, tanh on H cols.
    sig = jax.nn.sigmoid(gates[:, 0:3 * H])
    g_g = jnp.tanh(gates[:, 3 * H:4 * H])
    i_g = sig[:, 0 * H:1 * H]
    f_g = sig[:, 1 * H:2 * H]
    o_g = sig[:, 2 * H:3 * H]

    c = f_g * c0_ref[...].astype(jnp.float32) + i_g * g_g
    h = o_g * jnp.tanh(c)

    # Output head on VPU/XLU: broadcast-multiply + lane reduction.
    w_out_row = consts_ref[1:2, 0:H]                      # (1, H)
    b_out = consts_ref[1:2, H:H + 1]                      # (1, 1)
    out = jnp.sum(h * w_out_row, axis=-1, keepdims=True) + b_out

    # Direct lane-slice stores into the packed, lane-dense output tile.
    out_ref[:, 0:H] = h.astype(out_ref.dtype)
    out_ref[:, H:2 * H] = c.astype(out_ref.dtype)
    out_ref[:, 2 * H:2 * H + 1] = out.astype(out_ref.dtype)


def _critic_rnn_zero_state_kernel(x_ref, w_x_ref, consts_ref, out_ref, *,
                                  H, matmul_dtype):
    """Specialized lstm_hidden=None path: no h0/c0 streamed, c = i*g."""
    gates = jnp.dot(x_ref[...].astype(matmul_dtype), w_x_ref[...],
                    preferred_element_type=jnp.float32)
    gates = gates + consts_ref[0:1, :]

    sig = jax.nn.sigmoid(gates[:, 0:3 * H])
    g_g = jnp.tanh(gates[:, 3 * H:4 * H])
    i_g = sig[:, 0 * H:1 * H]
    o_g = sig[:, 2 * H:3 * H]

    c = i_g * g_g
    h = o_g * jnp.tanh(c)

    w_out_row = consts_ref[1:2, 0:H]
    b_out = consts_ref[1:2, H:H + 1]
    out = jnp.sum(h * w_out_row, axis=-1, keepdims=True) + b_out

    out_ref[:, 0:H] = h.astype(out_ref.dtype)
    out_ref[:, H:2 * H] = c.astype(out_ref.dtype)
    out_ref[:, 2 * H:2 * H + 1] = out.astype(out_ref.dtype)


# ----------------------------------------------------------------------------
# Parameter folding
# ----------------------------------------------------------------------------
def _fold_params(params, matmul_dtype):
    """Fold emb Linear into LSTM input projection; permute gates to [i,f,o,g]."""
    H = params["w_emb"].shape[1]
    f32 = jnp.float32

    w_x = params["w_emb"].astype(f32) @ params["w_ih"].astype(f32)    # (n_in, 4H)
    w_hh = params["w_hh"].astype(f32)                                 # (H, 4H)
    b_fused = (params["b_emb"].astype(f32) @ params["w_ih"].astype(f32)
               + params["b_ih"].astype(f32) + params["b_hh"].astype(f32))

    def perm(a):  # PyTorch gate order [i, f, g, o] -> [i, f, o, g]
        return jnp.concatenate(
            [a[..., 0:H], a[..., H:2 * H], a[..., 3 * H:4 * H], a[..., 2 * H:3 * H]],
            axis=-1)

    w_x, w_hh, b_fused = perm(w_x), perm(w_hh), perm(b_fused)

    consts = jnp.zeros((2, 4 * H), f32)
    consts = consts.at[0, :].set(b_fused[0])
    consts = consts.at[1, :H].set(params["w_out"][:, 0].astype(f32))
    consts = consts.at[1, H].set(params["b_out"][0, 0].astype(f32))
    return w_x.astype(matmul_dtype), w_hh.astype(matmul_dtype), consts


# ----------------------------------------------------------------------------
# Wrapper
# ----------------------------------------------------------------------------
def critic_rnn_forward(x, params, lstm_hidden=None, *,
                       matmul_dtype=jnp.bfloat16, pack_dtype=jnp.float32,
                       batch_tile=2048):
    """Pallas-fused forward of CriticRNN. Returns (out, (h, c)) like the module.

    matmul_dtype: MXU operand dtype (accumulation & elementwise stay f32).
    pack_dtype:   dtype of the packed (TB, 128) output tile (bf16 halves the
                  dominant HBM writeback stream at the cost of h/c precision).
    batch_tile:   max rows per grid step. Double-buffered per-step footprint at
                  TB=2048 f32 is ~3.5 MiB -- well under even v5e's 16 MiB
                  default scoped VMEM, so no vmem_limit override is needed.
    """
    B, n_in = x.shape
    H = params["w_emb"].shape[1]
    PACK = _round_up(2 * H + 1, 128)          # lane-dense packed output width

    # Batch tile: multiple of 8; aim for >=2 grid steps when B is big enough so
    # the "parallel" axis shards across both TensorCores on v7x.
    TB = min(_round_up(B, 8), batch_tile)
    if B >= 16 and _round_up(B, 8) <= batch_tile:
        TB = min(TB, _round_up((B + 1) // 2, 8))
    B_pad = _round_up(B, TB)

    def _pad(a):
        return jnp.pad(a, ((0, B_pad - B), (0, 0))) if B_pad != B else a

    w_x, w_hh, consts = _fold_params(params, matmul_dtype)
    cparams = pltpu.CompilerParams(dimension_semantics=("parallel",))
    out_shape = jax.ShapeDtypeStruct((B_pad, PACK), pack_dtype)
    out_spec = pl.BlockSpec((TB, PACK), lambda i: (i, 0))

    if lstm_hidden is None:
        kernel = functools.partial(_critic_rnn_zero_state_kernel,
                                   H=H, matmul_dtype=matmul_dtype)
        packed = pl.pallas_call(
            kernel,
            out_shape=out_shape,
            grid_spec=pltpu.PrefetchScalarGridSpec(
                num_scalar_prefetch=0,
                grid=(B_pad // TB,),
                in_specs=[
                    pl.BlockSpec((TB, n_in), lambda i: (i, 0)),        # x
                    pl.BlockSpec((n_in, 4 * H), lambda i: (0, 0)),     # W_x
                    pl.BlockSpec((2, 4 * H), lambda i: (0, 0)),        # consts
                ],
                out_specs=out_spec,
            ),
            compiler_params=cparams,
        )(_pad(x), w_x, consts)
    else:
        h0, c0 = lstm_hidden
        kernel = functools.partial(_critic_rnn_kernel,
                                   H=H, matmul_dtype=matmul_dtype)
        packed = pl.pallas_call(
            kernel,
            out_shape=out_shape,
            grid_spec=pltpu.PrefetchScalarGridSpec(
                num_scalar_prefetch=0,
                grid=(B_pad // TB,),
                in_specs=[
                    pl.BlockSpec((TB, n_in), lambda i: (i, 0)),        # x
                    pl.BlockSpec((TB, H), lambda i: (i, 0)),           # h0
                    pl.BlockSpec((TB, H), lambda i: (i, 0)),           # c0
                    pl.BlockSpec((n_in, 4 * H), lambda i: (0, 0)),     # W_x
                    pl.BlockSpec((H, 4 * H), lambda i: (0, 0)),        # W_hh
                    pl.BlockSpec((2, 4 * H), lambda i: (0, 0)),        # consts
                ],
                out_specs=out_spec,
            ),
            compiler_params=cparams,
        )(_pad(x), _pad(h0), _pad(c0), w_x, w_hh, consts)

    h = packed[:B, 0:H]
    c = packed[:B, H:2 * H]
    out = packed[:B, 2 * H:2 * H + 1]
    return out, (h, c)


# ----------------------------------------------------------------------------
# Init + plain-JAX reference (mirrors the PyTorch module)
# ----------------------------------------------------------------------------
def init_params(n_inputs, hidden_size, key):
    """Deterministic init mirroring nn.Linear / nn.LSTMCell shapes (pre-transposed)."""
    H = hidden_size
    keys = jax.random.split(key, 8)

    def unif(k, shape, fan_in):
        bound = 1.0 / jnp.sqrt(jnp.float32(fan_in))
        return jax.random.uniform(k, shape, jnp.float32, -bound, bound)

    return {
        "w_emb": unif(keys[0], (n_inputs, H), n_inputs),   # nn.Linear(n_in, H)
        "b_emb": unif(keys[1], (1, H), n_inputs),
        "w_ih": unif(keys[2], (H, 4 * H), H),              # nn.LSTMCell, gates [i,f,g,o]
        "b_ih": unif(keys[3], (1, 4 * H), H),
        "w_hh": unif(keys[4], (H, 4 * H), H),
        "b_hh": unif(keys[5], (1, 4 * H), H),
        "w_out": unif(keys[6], (H, 1), H),                 # nn.Linear(H, 1)
        "b_out": unif(keys[7], (1, 1), H),
    }


def critic_rnn_reference(x, params, lstm_hidden=None):
    """Plain-JAX (unfused) reference matching the PyTorch module."""
    H = params["w_emb"].shape[1]
    B = x.shape[0]
    if lstm_hidden is None:
        h0 = jnp.zeros((B, H), jnp.float32)
        c0 = jnp.zeros((B, H), jnp.float32)
    else:
        h0, c0 = lstm_hidden
    emb = x @ params["w_emb"] + params["b_emb"]
    gates = emb @ params["w_ih"] + params["b_ih"] + h0 @ params["w_hh"] + params["b_hh"]
    i = jax.nn.sigmoid(gates[:, 0 * H:1 * H])
    f = jax.nn.sigmoid(gates[:, 1 * H:2 * H])
    g = jnp.tanh(gates[:, 2 * H:3 * H])
    o = jax.nn.sigmoid(gates[:, 3 * H:4 * H])
    c = f * c0 + i * g
    h = o * jnp.tanh(c)
    out = h @ params["w_out"] + params["b_out"]
    return out, (h, c)


if __name__ == "__main__":
    B = 8
    N_INPUTS = 16
    HIDDEN = 32

    key = jax.random.PRNGKey(0)
    kx, kp, kh, kc = jax.random.split(key, 4)

    x = jax.random.normal(kx, (B, N_INPUTS), jnp.float32)
    params = init_params(N_INPUTS, HIDDEN, kp)

    # Case 1: zero hidden state (specialized path), f32 MXU operands.
    out, (h, c) = critic_rnn_forward(x, params, matmul_dtype=jnp.float32)
    jax.block_until_ready((out, h, c))
    out_r, (h_r, c_r) = critic_rnn_reference(x, params)
    assert jnp.allclose(out, out_r, atol=1e-4), "out mismatch"
    assert jnp.allclose(h, h_r, atol=1e-4), "h mismatch"
    assert jnp.allclose(c, c_r, atol=1e-4), "c mismatch"

    # Case 2: explicit hidden state, f32 MXU operands.
    h_in = jax.random.normal(kh, (B, HIDDEN), jnp.float32)
    c_in = jax.random.normal(kc, (B, HIDDEN), jnp.float32)
    out2, (h2, c2) = critic_rnn_forward(x, params, (h_in, c_in),
                                        matmul_dtype=jnp.float32)
    jax.block_until_ready((out2, h2, c2))
    out2_r, (h2_r, c2_r) = critic_rnn_reference(x, params, (h_in, c_in))
    assert jnp.allclose(out2, out2_r, atol=1e-4), "out (hidden) mismatch"
    assert jnp.allclose(h2, h2_r, atol=1e-4), "h (hidden) mismatch"
    assert jnp.allclose(c2, c2_r, atol=1e-4), "c (hidden) mismatch"

    # Case 3: exercise the batch grid (batch_tile=8 -> grid=(3,), "parallel").
    B3 = 24
    x3 = jax.random.normal(jax.random.PRNGKey(3), (B3, N_INPUTS), jnp.float32)
    out3, (h3, c3) = critic_rnn_forward(x3, params, batch_tile=8,
                                        matmul_dtype=jnp.float32)
    jax.block_until_ready((out3, h3, c3))
    out3_r, (h3_r, c3_r) = critic_rnn_reference(x3, params)
    assert jnp.allclose(out3, out3_r, atol=1e-4), "out (grid) mismatch"
    assert jnp.allclose(h3, h3_r, atol=1e-4), "h (grid) mismatch"
    assert jnp.allclose(c3, c3_r, atol=1e-4), "c (grid) mismatch"

    # Case 4: defaults -- bf16 MXU operands + bf16 packed output, loose tolerance.
    out4, (h4, c4) = critic_rnn_forward(x, params, (h_in, c_in),
                                        pack_dtype=jnp.bfloat16)
    jax.block_until_ready((out4, h4, c4))
    assert jnp.allclose(out4.astype(jnp.float32), out2_r, atol=5e-2), "out (bf16) mismatch"
    assert jnp.allclose(h4.astype(jnp.float32), h2_r, atol=5e-2), "h (bf16) mismatch"
    assert jnp.allclose(c4.astype(jnp.float32), c2_r, atol=5e-2), "c (bf16) mismatch"

    print("KERNEL_OK")
</pallas_src>

<mosaic_0001>
module attributes {stable_mosaic.version = 11 : i64} {
  func.func @_critic_rnn_zero_state_kernel(%arg0: i32, %arg1: memref<8x16xf32, #tpu.memory_space<vmem>>, %arg2: memref<16x128xf32, #tpu.memory_space<vmem>>, %arg3: memref<2x128xf32, #tpu.memory_space<vmem>>, %arg4: memref<8x128xf32, #tpu.memory_space<vmem>>) attributes {dimension_semantics = [#tpu.dimension_semantics<parallel>], iteration_bounds = array<i64: 1>, scalar_prefetch = 0 : i64, scratch_operands = 0 : i64, tpu.core_type = #tpu.core_type<tc>, window_params = [{transform_indices = @transform_0, window_bounds = array<i64: 8, 16>}, {pipeline_mode = #tpu.pipeline_mode<synchronous>, transform_indices = @transform_1, window_bounds = array<i64: 16, 128>}, {pipeline_mode = #tpu.pipeline_mode<synchronous>, transform_indices = @transform_2, window_bounds = array<i64: 2, 128>}, {transform_indices = @transform_3, window_bounds = array<i64: 8, 128>}]} {
    %c0 = arith.constant 0 : index
    %c0_0 = arith.constant 0 : index
    %0 = vector.load %arg1[%c0, %c0_0] : memref<8x16xf32, #tpu.memory_space<vmem>>, vector<8x16xf32>
    %c0_1 = arith.constant 0 : index
    %c0_2 = arith.constant 0 : index
    %1 = vector.load %arg2[%c0_1, %c0_2] : memref<16x128xf32, #tpu.memory_space<vmem>>, vector<16x128xf32>
    %cst = arith.constant dense<0.000000e+00> : vector<8x128xf32>
    %2 = tpu.matmul %0, %1, %cst {dimension_numbers = #tpu.dot_dimension_numbers<[1], [0], [0], [1], [0, 0, 1, 1], [], []>} : vector<8x16xf32>, vector<16x128xf32>, vector<8x128xf32> -> vector<8x128xf32>
    %c0_3 = arith.constant 0 : index
    %c0_4 = arith.constant 0 : index
    %3 = vector.load %arg3[%c0_3, %c0_4] : memref<2x128xf32, #tpu.memory_space<vmem>>, vector<1x128xf32>
    %4 = vector.broadcast %3 : vector<1x128xf32> to vector<8x128xf32>
    %5 = arith.addf %2, %4 : vector<8x128xf32>
    %6 = vector.extract_strided_slice %5 {offsets = [0, 0], sizes = [8, 96], strides = [1, 1]} : vector<8x128xf32> to vector<8x96xf32>
    %7 = arith.negf %6 : vector<8x96xf32>
    %8 = math.exp %7 : vector<8x96xf32>
    %cst_5 = arith.constant 1.000000e+00 : f32
    %9 = vector.broadcast %cst_5 : f32 to vector<8x96xf32>
    %10 = arith.addf %9, %8 : vector<8x96xf32>
    %11 = arith.divf %9, %10 : vector<8x96xf32>
    %12 = vector.extract_strided_slice %5 {offsets = [0, 96], sizes = [8, 32], strides = [1, 1]} : vector<8x128xf32> to vector<8x32xf32>
    %13 = math.tanh %12 : vector<8x32xf32>
    %14 = vector.extract_strided_slice %11 {offsets = [0, 0], sizes = [8, 32], strides = [1, 1]} : vector<8x96xf32> to vector<8x32xf32>
    %15 = vector.extract_strided_slice %11 {offsets = [0, 64], sizes = [8, 32], strides = [1, 1]} : vector<8x96xf32> to vector<8x32xf32>
    %16 = arith.mulf %14, %13 : vector<8x32xf32>
    %17 = math.tanh %16 : vector<8x32xf32>
    %18 = arith.mulf %15, %17 : vector<8x32xf32>
    %c1 = arith.constant 1 : index
    %c0_6 = arith.constant 0 : index
    %19 = vector.load %arg3[%c1, %c0_6] : memref<2x128xf32, #tpu.memory_space<vmem>>, vector<1x32xf32>
    %c1_7 = arith.constant 1 : index
    %c32 = arith.constant 32 : index
    %20 = vector.load %arg3[%c1_7, %c32] : memref<2x128xf32, #tpu.memory_space<vmem>>, vector<1x1xf32>
    %21 = vector.broadcast %19 : vector<1x32xf32> to vector<8x32xf32>
    %22 = arith.mulf %18, %21 : vector<8x32xf32>
    %cst_8 = arith.constant dense<0.000000e+00> : vector<8xf32>
    %23 = vector.multi_reduction <add>, %22, %cst_8 [1] : vector<8x32xf32> to vector<8xf32>
    %24 = vector.shape_cast %23 : vector<8xf32> to vector<8x1xf32>
    %25 = vector.broadcast %20 : vector<1x1xf32> to vector<8x1xf32>
    %26 = arith.addf %24, %25 : vector<8x1xf32>
    %c0_9 = arith.constant 0 : index
    %c0_10 = arith.constant 0 : index
    %27 = vector.load %arg4[%c0_9, %c0_10] : memref<8x128xf32, #tpu.memory_space<vmem>>, vector<8x32xf32>
    tpu.vector_store %arg4[%c0_9, %c0_10], %18 {strides = array<i32>} : memref<8x128xf32, #tpu.memory_space<vmem>>, vector<8x32xf32>,
    %c0_11 = arith.constant 0 : index
    %c32_12 = arith.constant 32 : index
    %28 = vector.load %arg4[%c0_11, %c32_12] : memref<8x128xf32, #tpu.memory_space<vmem>>, vector<8x32xf32>
    tpu.vector_store %arg4[%c0_11, %c32_12], %16 {strides = array<i32>} : memref<8x128xf32, #tpu.memory_space<vmem>>, vector<8x32xf32>,
    %c0_13 = arith.constant 0 : index
    %c64 = arith.constant 64 : index
    %29 = vector.load %arg4[%c0_13, %c64] : memref<8x128xf32, #tpu.memory_space<vmem>>, vector<8x1xf32>
    tpu.vector_store %arg4[%c0_13, %c64], %26 {strides = array<i32>} : memref<8x128xf32, #tpu.memory_space<vmem>>, vector<8x1xf32>,
    return
  }
  func.func @transform_0(%arg0: i32) -> (i32, i32) {
    %c0_i32 = arith.constant 0 : i32
    %c0_i32_0 = arith.constant 0 : i32
    return %arg0, %c0_i32 : i32, i32
  }
  func.func @transform_1(%arg0: i32) -> (i32, i32) {
    %c0_i32 = arith.constant 0 : i32
    %c0_i32_0 = arith.constant 0 : i32
    %c0_i32_1 = arith.constant 0 : i32
    return %c0_i32, %c0_i32_0 : i32, i32
  }
  func.func @transform_2(%arg0: i32) -> (i32, i32) {
    %c0_i32 = arith.constant 0 : i32
    %c0_i32_0 = arith.constant 0 : i32
    %c0_i32_1 = arith.constant 0 : i32
    return %c0_i32, %c0_i32_0 : i32, i32
  }
  func.func @transform_3(%arg0: i32) -> (i32, i32) {
    %c0_i32 = arith.constant 0 : i32
    %c0_i32_0 = arith.constant 0 : i32
    return %arg0, %c0_i32 : i32, i32
  }
}

</mosaic_0001>

<bundles_post_ra>
// kernel: tpu_custom_call.1
= control target key start
LH: loop header
LB: loop body
LE: loop exit
PB: predicated region body
PF: predicated region fallthrough
CT: control target
= control target key end

     0   :  { %8 = vsyncpa [#allocation3], 0  ;;  %s337_s0 = inlined_call_operand.hbm [shape: f32[8,16], index: 0, kind: input, shape index: {}]   ;;  %s338_s1 = inlined_call_operand.hbm [shape: f32[16,128], index: 1, kind: input, shape index: {}]   ;;  %s339_s2 = inlined_call_operand.vmem [shape: f32[2,128], index: 2, kind: input, shape index: {}]   ;;  %s340_s3 = inlined_call_operand.hbm [shape: f32[8,128], index: 3, kind: output, shape index: {}]  }
   0x1   :  { %9 = vsyncpa [#allocation6], 0 }
   0x2   :  { %10 = vsyncpa [#allocation4], 0  ;;  %s290_s12 = smov [#allocation2]   ;;  %s291_s14 = smov [#allocation5]  }
   0x3   :  { %s17_s13 = sshll.u32 %s290_s12, 4  ;;  %s26_s15 = sshll.u32 %s291_s14, 4  ;;  %s18_s13 = int_to_ptr.vmem [resolvable:$true] %s17_s13  ;;  %s27_s15 = int_to_ptr.vmem [resolvable:$true] %s26_s15 }
   0x4   :  { %s232_s16 = scalar_lea.vmem %s18_s13, 128  ;;  %p237_p1 = scmp.lt.s32.totalorder %s18_s13, %s18_s13 }
   0x5   :  { %p233_p0 = scmp.ne.s32.totalorder %s18_s13, %s232_s16  ;;  %p238_p2 = scmp.lt.s32.totalorder %s232_s16, %s232_s16 }
   0x7   :  { %p239_p3 = por %p238_p2, %p237_p1 }
   0x9   :  { %p240_p4 = pnand %p239_p3, %p233_p0 }
   0xb   :  { %243 = shalt.err (!%p240_p4)
}
   0xc   :  { %20 = dma.hbm_to_vmem [thread:$0]  %s337_s0, 128, %s18_s13, [#allocation3]  }
   0xd   :  { %s252_s19 = scalar_lea.vmem %s27_s15, 256  ;;  %p257_p6 = scmp.lt.s32.totalorder %s27_s15, %s27_s15 }
   0xe   :  { %p253_p5 = scmp.ne.s32.totalorder %s27_s15, %s252_s19  ;;  %p258_p7 = scmp.lt.s32.totalorder %s252_s19, %s252_s19 }
  0x10   :  { %p259_p8 = por %p258_p7, %p257_p6 }
  0x12   :  { %p260_p9 = pnand %p259_p8, %p253_p5 }
  0x14   :  { %263 = shalt.err (!%p260_p9)
}
  0x15   :  { %s292_s20 = smov 128   ;;  %s293_s21 = smov 8  }
  0x16   :  { %32 = dma.hbm_to_vmem [thread:$0]  %s338_s1, 256, %s27_s15, [#allocation6], %s292_s20, %s292_s20, %s293_s21  }
  0x17   :  { %284 = dma.done.wait [#allocation3], 128  }
  0x18   :  { %285 = vsyncadd [#allocation3], 4294967168 }
  0x19   :  { %286 = dma.done.wait [#allocation6], 256  }
  0x1a   :  { %287 = vsyncadd [#allocation6], 4294967040  ;;  %v294_v0 = vmov 0.0   ;;  %vm295_vm0 = vmmov 0   ;;  %v43_v1 = vld [vmem:[#allocation5 + $0x8] sm:$0xff]  ;;  %v42_v2 = vld [vmem:[#allocation5] sm:$0xff] }
  0x1b   :  { %200 = vmatprep.subr.mxu0 %v294_v0  ;;  %204 = vmatprep.mubr.msk.f32.mxu0 %vm295_vm0, %v294_v0  ;;  %v41_v3 = vld [vmem:[#allocation2] sm:$0xff]  ;;  %vm49_vm1 = vcmask 130048   ;;  %s296_s1 = smov 32   ;;  %s297_s27 = smov 64   ;;  %vm155_vm2 = vcmask 261120   ;;  %vm169_vm3 = vcmask 523520  }
  0x1c   :  { %201 = vmatpush3.msra.mxu0 %v43_v1  ;;  %v193_v4 = vld [vmem:[%s339_s2] ss:$0 sm:$0xff]  ;;  %v196_v9 = vld [vmem:[%s339_s2 + $0x1] ss:$0 sm:$0xff]  ;;  %s298_s2 = smov [#allocation7]   ;;  %vm175_vm4 = vcmask 531968  }
  0x1d   :  { %202 = vmatprep.subr.mxu0 %v294_v0  ;;  %147 = vrot.lane.b32.xlu1 %v196_v9, %s297_s27  ;;  %s183_s28 = sshll.u32 %s298_s2, 4  ;;  %s184_s28 = int_to_ptr.vmem [resolvable:$true] %s183_s28 }
  0x1e   :  { %203 = vmatpush3.msra.mxu0 %v42_v2  ;;  %s264_s29 = scalar_lea.vmem %s184_s28, 128  ;;  %p269_p11 = scmp.lt.s32.totalorder %s184_s28, %s184_s28 }
  0x1f   :  { %205 = vmatmul.mubr.msk.f32.vlgmr.msra.gmra.mxu0 %vm49_vm1, %v41_v3  ;;  %p265_p10 = scmp.ne.s32.totalorder %s184_s28, %s264_s29  ;;  %p270_p12 = scmp.lt.s32.totalorder %s264_s29, %s264_s29 }
  0x21   :  { %p271_p13 = por %p270_p12, %p269_p11 }
  0x23   :  { %p272_p0 = pnand %p271_p13, %p265_p10 }
  0x8f   :  { %v148_v18 = vpop.permute.xlu1 %147 }
  0xdf   :  { %v119_v5 = vpop.f32.mrf.mxu0 }
  0xe0   :  { %v120_v6 = vadd.f32 %v193_v4, %v119_v5 }
  0xe1   :  { %v206_v7 = vpop.f32.mrf.mxu0 }
  0xe2   :  { %216 = vtanh.f32 %v120_v6  ;;  %v195_v10 = vmul.f32 -1.442695, %v120_v6 }
  0xe4   :  { %218 = vpow2.f32 %v195_v10 }
  0xef   :  { %v217_v8 = vpop.eup %216 }
  0xf0   :  { %131 = vrot.lane.b32.xlu0 %v217_v8, %s296_s1 }
  0xf1   :  { %v219_v11 = vpop.eup %218 }
  0xf2   :  { %v126_v12 = vadd.f32 1.0, %v219_v11 }
  0xf4   :  { %220 = vrcp.f32 %v126_v12 }
 0x101   :  { %v221_v13 = vpop.eup %220 }
 0x162   :  { %v132_v14 = vpop.permute.xlu0 %131 }
 0x163   :  { %v134_v15 = vmul.f32 %v221_v13, %v132_v14 }
 0x165   :  { %222 = vtanh.f32 %v134_v15 }
 0x172   :  { %v223_v16 = vpop.eup %222 }
 0x173   :  { %137 = vrot.lane.b32.xlu0 %v223_v16, %s297_s27 }
 0x1e5   :  { %v138_v17 = vpop.permute.xlu0 %137 }
 0x1e6   :  { %v140_v19 = vmul.f32 %v221_v13, %v138_v17 }
 0x1e8   :  { %v150_v20 = vmul.f32 %v148_v18, %v140_v19 }
 0x1ea   :  { %152 = vrot.lane.b32.xlu1 %v150_v20, %s297_s27 }
 0x1ee   :  { %161 = vrot.lane.b32.xlu1 %v140_v19, %s297_s27 }
 0x1f2   :  { %166 = vrot.lane.b32.xlu1 %v134_v15, %s296_s1 }
 0x25c   :  { %v153_v21 = vpop.permute.xlu1 %152 }
 0x25d   :  { %v156_v22 = vsel %vm155_vm2, %v153_v21, 0.0 }
 0x25e   :  { %157 = vadd.xlane.f32.xlu0 %v156_v22 }
 0x260   :  { %v162_v23 = vpop.permute.xlu1 %161 }
 0x261   :  { %164 = vst.msk [vmem:[#allocation7] sm:$0xff] %vm155_vm2, %v162_v23 }
 0x264   :  { %v167_v24 = vpop.permute.xlu1 %166 }
 0x265   :  { %170 = vst.msk [vmem:[#allocation7] sm:$0xff] %vm169_vm3, %v167_v24 }
 0x2e7   :  { %v158_v25 = vpop.xlane.xlu0 %157 }
 0x2e8   :  { %v159_v26 = vadd.f32 %v196_v9, %v158_v25 }
 0x2ea   :  { %172 = vrot.lane.b32.xlu1 %v159_v26, %s296_s1 }
 0x35c   :  { %v173_v27 = vpop.permute.xlu1 %172 }
 0x35d   :  { %176 = vst.msk [vmem:[#allocation7] sm:$0xff] %vm175_vm4, %v173_v27 }
 0x35e   :  { %275 = shalt.err (!%p272_p0)
}
 0x35f   :  { %186 = dma.vmem_to_hbm [thread:$0]  %s184_s28, 128, %s340_s3, [#allocation4]  }
 0x360   :  { %288 = dma.done.wait [#allocation4], 128  }
 0x361   :  { %289 = vsyncadd [#allocation4], 4294967168 }
 0x362   :  { %190 = vsyncpa [#allocation3], 1 }
 0x363   :  { %191 = vsyncpa [#allocation6], 1 }
 0x364   :  { %192 = vsyncpa [#allocation4], 1 }

</bundles_post_ra>
